<compile_context>
chip_gen: v6e
topology: v6e:2x2x1
jax: 0.10.0
libtpu: 0.0.40
codegen_flags: <defaults>
</compile_context>

<pallas_src>
import functools

import jax
import jax.numpy as jnp
from jax.experimental import pallas as pl
from jax.experimental.pallas import tpu as pltpu


_LANE = 128
_SUBLANE = 8
_VOCAB_CHUNK = 512        # contraction chunk for the one-hot matmul


def _round_up(x: int, m: int) -> int:
    return ((x + m - 1) // m) * m


def _vmem_capacity_bytes() -> int:
    """Per-core VMEM capacity; conservative fallback = v7x's 64 MiB."""
    try:
        return int(pltpu.get_tpu_info().vmem_capacity_bytes)
    except Exception:
        return 64 * 1024 * 1024


def _onehot_gather_kernel(idx_ref, table_ref, out_ref, *, vocab_chunks):
    """One grid step: gather a (tb, d_pad) tile via one-hot MXU matmuls.

    idx_ref   : VMEM (tb, 1) int32        -- token ids for this tile
    table_ref : VMEM (vocab_pad, d_pad)   -- whole table, resident across grid
    out_ref   : VMEM (tb, d_pad)          -- lane/sublane-dense output tile
    """
    idx = idx_ref[...]                                       # (tb, 1) int32
    tb = out_ref.shape[0]
    acc = jnp.zeros(out_ref.shape, jnp.float32)
    for off, size in vocab_chunks:                           # static, unrolled
        cols = jax.lax.broadcasted_iota(jnp.int32, (tb, size), 1) + off
        one_hot = (idx == cols).astype(table_ref.dtype)      # (tb, size)
        acc = acc + jnp.dot(one_hot, table_ref[off:off + size, :],
                            preferred_element_type=jnp.float32)
    out_ref[...] = acc.astype(out_ref.dtype)


def _build_gather_call(*, tb, n_pad, vocab_pad, d_pad, dtype, vocab_chunks,
                       vmem_limit, single_buffer_table):
    table_spec_kwargs = {}
    if single_buffer_table:
        # Constant index_map -> same block every grid step; one buffer suffices.
        table_spec_kwargs = dict(pipeline_mode=pl.Buffered(1))
    return pl.pallas_call(
        functools.partial(_onehot_gather_kernel, vocab_chunks=vocab_chunks),
        out_shape=jax.ShapeDtypeStruct((n_pad, d_pad), dtype),
        grid=(n_pad // tb,),
        in_specs=[
            pl.BlockSpec((tb, 1), lambda i: (i, 0)),
            pl.BlockSpec((vocab_pad, d_pad), lambda i: (0, 0),
                         **table_spec_kwargs),
        ],
        out_specs=pl.BlockSpec((tb, d_pad), lambda i: (i, 0)),
        compiler_params=pltpu.CompilerParams(
            dimension_semantics=("parallel",),    # lets v7x shard across TCs
            vmem_limit_bytes=vmem_limit,
        ),
    )


def glove_embedding_lookup(indices: jax.Array, table: jax.Array,
                           *, block_tokens: int = 256) -> jax.Array:
    """Equivalent of SingletonGloVeEmbedding.forward(x) == embed(x)."""
    orig_shape = indices.shape
    flat_idx = indices.reshape(-1).astype(jnp.int32)
    n_tokens = int(flat_idx.shape[0])
    vocab, embed_dim = table.shape

    # Frozen GloVe semantics: row 0 is the zeroed padding row
    # (torch.cat([zeros_like(vectors[[0]]), vectors[1:]])).  Enforce it.
    table = table.at[0].set(0)

    # Safety net: clamp ids so a bad index can never select an OOB row.
    # (nn.Embedding would raise on OOB; here OOB ids map to the last row.)
    flat_idx = jnp.clip(flat_idx, 0, vocab - 1)

    # Lane-dense embedding dim, 128-aligned vocab (clean MXU contraction).
    # Optionally the table could be cast to bf16 here to halve residency.
    d_pad = _round_up(embed_dim, _LANE)
    vocab_pad = _round_up(vocab, _LANE)
    if (vocab_pad, d_pad) != (vocab, embed_dim):
        table = jnp.pad(table, ((0, vocab_pad - vocab), (0, d_pad - embed_dim)))

    # Static vocab chunking for the one-hot contraction (each chunk a
    # multiple of 128 since vocab_pad is).
    vocab_chunks = tuple(
        (off, min(_VOCAB_CHUNK, vocab_pad - off))
        for off in range(0, vocab_pad, _VOCAB_CHUNK))

    # Token tile: multiple of 8.  For small inputs cap tb at ~half the stream
    # so the "parallel" grid axis has >= 2 steps (both v7x TCs get work).
    tokens_rounded = _round_up(max(n_tokens, 1), _SUBLANE)
    tb = min(block_tokens, tokens_rounded)
    if tokens_rounded >= 2 * _SUBLANE:
        tb = min(tb, max(_SUBLANE, (tokens_rounded // 2 // _SUBLANE) * _SUBLANE))
    n_pad = _round_up(max(n_tokens, 1), tb)

    if n_pad != n_tokens:
        flat_idx = jnp.pad(flat_idx, (0, n_pad - n_tokens))   # pad id 0 = zero row
    idx2d = flat_idx.reshape(n_pad, 1)

    # Generation-aware VMEM budget.  Worst case assumes the table block ends
    # up double-buffered (in case the single-buffer request isn't honored).
    itemsize = table.dtype.itemsize
    table_bytes = vocab_pad * d_pad * itemsize
    io_bytes = 2 * (tb * 4) + 2 * (tb * d_pad * itemsize)     # idx + out, dbl-buffered
    headroom = 8 * 1024 * 1024
    vmem_cap = _vmem_capacity_bytes()
    worst_resident = 2 * table_bytes + io_bytes + headroom
    if worst_resident > vmem_cap:
        raise NotImplementedError(
            f"GloVe table ({table_bytes / 2**20:.1f} MiB padded) does not fit the "
            f"VMEM-resident gather path on this chip ({vmem_cap / 2**20:.0f} MiB "
            "per core); needs the manual HBM row-fetch ring (see TODO).")
    vmem_limit = int(min(vmem_cap, max(worst_resident, 16 * 1024 * 1024)))

    call_kwargs = dict(tb=tb, n_pad=n_pad, vocab_pad=vocab_pad, d_pad=d_pad,
                       dtype=table.dtype, vocab_chunks=vocab_chunks,
                       vmem_limit=vmem_limit)
    try:
        out_flat = _build_gather_call(single_buffer_table=True,
                                      **call_kwargs)(idx2d, table)
    except Exception:
        # This JAX/Mosaic build rejected pipeline_mode=pl.Buffered(1); the
        # default double-buffered table block still fits the budget above.
        out_flat = _build_gather_call(single_buffer_table=False,
                                      **call_kwargs)(idx2d, table)

    out = out_flat[:n_tokens, :embed_dim]
    return out.reshape(*orig_shape, embed_dim)


def make_glove_table(key, vocab: int, embed_dim: int) -> jax.Array:
    """Deterministic synthetic GloVe table; row 0 forced to zeros, matching
    torch.cat([zeros_like(vectors[[0]]), vectors[1:]])."""
    vectors = jax.random.normal(key, (vocab, embed_dim), dtype=jnp.float32)
    return vectors.at[0].set(0.0)


if __name__ == "__main__":
    key = jax.random.PRNGKey(0)
    k_table, k_idx = jax.random.split(key)

    vocab = 512          # synthetic GloVe vocab (row 0 = padding / zeros)
    embed_dim = 100      # real GloVe dim -> exercises the pad-to-128 path
    batch, seq = 2, 8

    table = make_glove_table(k_table, vocab, embed_dim)
    # Include index 0 explicitly so the zeroed row is exercised.
    x = jax.random.randint(k_idx, (batch, seq), minval=0, maxval=vocab,
                           dtype=jnp.int32)
    x = x.at[0, 0].set(0)

    out = glove_embedding_lookup(x, table)
    out = jax.block_until_ready(out)

    # Correctness check against a plain-JAX embedding lookup.
    ref = jnp.take(table, x.reshape(-1), axis=0).reshape(batch, seq, embed_dim)
    assert out.shape == (batch, seq, embed_dim)
    assert out.dtype == jnp.float32
    assert bool(jnp.allclose(out, ref, rtol=1e-3, atol=1e-3)), \
        "mismatch vs reference gather"
    assert bool(jnp.all(out[0, 0] == 0.0)), "row 0 must be zero (frozen pad row)"

    print("KERNEL_OK")
</pallas_src>

<mosaic_0001>
module attributes {stable_mosaic.version = 11 : i64} {
  func.func @_onehot_gather_kernel(%arg0: i32, %arg1: memref<8x1xi32, #tpu.memory_space<vmem>>, %arg2: memref<512x128xf32, #tpu.memory_space<vmem>>, %arg3: memref<8x128xf32, #tpu.memory_space<vmem>>) attributes {dimension_semantics = [#tpu.dimension_semantics<parallel>], iteration_bounds = array<i64: 2>, scalar_prefetch = 0 : i64, scratch_operands = 0 : i64, tpu.core_type = #tpu.core_type<tc>, window_params = [{transform_indices = @transform_0, window_bounds = array<i64: 8, 1>}, {pipeline_mode = #tpu.pipeline_mode<synchronous>, transform_indices = @transform_1, window_bounds = array<i64: 512, 128>}, {transform_indices = @transform_2, window_bounds = array<i64: 8, 128>}]} {
    %c0 = arith.constant 0 : index
    %c0_0 = arith.constant 0 : index
    %0 = vector.load %arg1[%c0, %c0_0] : memref<8x1xi32, #tpu.memory_space<vmem>>, vector<8x1xi32>
    %cst = arith.constant 0.000000e+00 : f32
    %1 = vector.broadcast %cst : f32 to vector<8x128xf32>
    %2 = tpu.iota {dimensions = array<i32: 1>} : vector<8x512xi32>
    %c0_i32 = arith.constant 0 : i32
    %3 = vector.broadcast %c0_i32 : i32 to vector<8x512xi32>
    %4 = arith.addi %2, %3 : vector<8x512xi32>
    %5 = vector.broadcast %0 : vector<8x1xi32> to vector<8x512xi32>
    %6 = arith.cmpi eq, %5, %4 : vector<8x512xi32>
    %7 = arith.extui %6 : vector<8x512xi1> to vector<8x512xi32>
    %8 = arith.sitofp %7 : vector<8x512xi32> to vector<8x512xf32>
    %c0_1 = arith.constant 0 : index
    %c0_2 = arith.constant 0 : index
    %9 = vector.load %arg2[%c0_1, %c0_2] : memref<512x128xf32, #tpu.memory_space<vmem>>, vector<512x128xf32>
    %cst_3 = arith.constant dense<0.000000e+00> : vector<8x128xf32>
    %10 = tpu.matmul %8, %9, %cst_3 {dimension_numbers = #tpu.dot_dimension_numbers<[1], [0], [0], [1], [0, 0, 1, 1], [], []>} : vector<8x512xf32>, vector<512x128xf32>, vector<8x128xf32> -> vector<8x128xf32>
    %11 = arith.addf %1, %10 : vector<8x128xf32>
    %c0_4 = arith.constant 0 : index
    %c0_5 = arith.constant 0 : index
    %12 = vector.load %arg3[%c0_4, %c0_5] : memref<8x128xf32, #tpu.memory_space<vmem>>, vector<8x128xf32>
    tpu.vector_store %arg3[%c0_4, %c0_5], %11 {strides = array<i32>} : memref<8x128xf32, #tpu.memory_space<vmem>>, vector<8x128xf32>,
    return
  }
  func.func @transform_0(%arg0: i32) -> (i32, i32) {
    %c0_i32 = arith.constant 0 : i32
    %c0_i32_0 = arith.constant 0 : i32
    return %arg0, %c0_i32 : i32, i32
  }
  func.func @transform_1(%arg0: i32) -> (i32, i32) {
    %c0_i32 = arith.constant 0 : i32
    %c0_i32_0 = arith.constant 0 : i32
    %c0_i32_1 = arith.constant 0 : i32
    return %c0_i32, %c0_i32_0 : i32, i32
  }
  func.func @transform_2(%arg0: i32) -> (i32, i32) {
    %c0_i32 = arith.constant 0 : i32
    %c0_i32_0 = arith.constant 0 : i32
    return %arg0, %c0_i32 : i32, i32
  }
}

module attributes {stable_mosaic.version = 11 : i64} {
  func.func @_onehot_gather_kernel(%arg0: i32, %arg1: memref<8x1xi32, #tpu.memory_space<vmem>>, %arg2: memref<512x128xf32, #tpu.memory_space<vmem>>, %arg3: memref<8x128xf32, #tpu.memory_space<vmem>>) attributes {dimension_semantics = [#tpu.dimension_semantics<parallel>], iteration_bounds = array<i64: 2>, scalar_prefetch = 0 : i64, scratch_operands = 0 : i64, tpu.core_type = #tpu.core_type<tc>, window_params = [{transform_indices = @transform_0, window_bounds = array<i64: 8, 1>}, {pipeline_mode = #tpu.pipeline_mode<synchronous>, transform_indices = @transform_1, window_bounds = array<i64: 512, 128>}, {transform_indices = @transform_2, window_bounds = array<i64: 8, 128>}]} {
    %c0 = arith.constant 0 : index
    %c0_0 = arith.constant 0 : index
    %0 = vector.load %arg1[%c0, %c0_0] : memref<8x1xi32, #tpu.memory_space<vmem>>, vector<8x1xi32>
    %cst = arith.constant 0.000000e+00 : f32
    %1 = vector.broadcast %cst : f32 to vector<8x128xf32>
    %2 = tpu.iota {dimensions = array<i32: 1>} : vector<8x512xi32>
    %c0_i32 = arith.constant 0 : i32
    %3 = vector.broadcast %c0_i32 : i32 to vector<8x512xi32>
    %4 = arith.addi %2, %3 : vector<8x512xi32>
    %5 = vector.broadcast %0 : vector<8x1xi32> to vector<8x512xi32>
    %6 = arith.cmpi eq, %5, %4 : vector<8x512xi32>
    %7 = arith.extui %6 : vector<8x512xi1> to vector<8x512xi32>
    %8 = arith.sitofp %7 : vector<8x512xi32> to vector<8x512xf32>
    %c0_1 = arith.constant 0 : index
    %c0_2 = arith.constant 0 : index
    %9 = vector.load %arg2[%c0_1, %c0_2] : memref<512x128xf32, #tpu.memory_space<vmem>>, vector<512x128xf32>
    %cst_3 = arith.constant dense<0.000000e+00> : vector<8x128xf32>
    %10 = tpu.matmul %8, %9, %cst_3 {dimension_numbers = #tpu.dot_dimension_numbers<[1], [0], [0], [1], [0, 0, 1, 1], [], []>} : vector<8x512xf32>, vector<512x128xf32>, vector<8x128xf32> -> vector<8x128xf32>
    %11 = arith.addf %1, %10 : vector<8x128xf32>
    %c0_4 = arith.constant 0 : index
    %c0_5 = arith.constant 0 : index
    %12 = vector.load %arg3[%c0_4, %c0_5] : memref<8x128xf32, #tpu.memory_space<vmem>>, vector<8x128xf32>
    tpu.vector_store %arg3[%c0_4, %c0_5], %11 {strides = array<i32>} : memref<8x128xf32, #tpu.memory_space<vmem>>, vector<8x128xf32>,
    return
  }
  func.func @transform_0(%arg0: i32) -> (i32, i32) {
    %c0_i32 = arith.constant 0 : i32
    %c0_i32_0 = arith.constant 0 : i32
    return %arg0, %c0_i32 : i32, i32
  }
  func.func @transform_1(%arg0: i32) -> (i32, i32) {
    %c0_i32 = arith.constant 0 : i32
    %c0_i32_0 = arith.constant 0 : i32
    %c0_i32_1 = arith.constant 0 : i32
    return %c0_i32, %c0_i32_0 : i32, i32
  }
  func.func @transform_2(%arg0: i32) -> (i32, i32) {
    %c0_i32 = arith.constant 0 : i32
    %c0_i32_0 = arith.constant 0 : i32
    return %arg0, %c0_i32 : i32, i32
  }
}

</mosaic_0001>

<bundles_post_ra>
// kernel: tpu_custom_call.1
= control target key start
LH: loop header
LB: loop body
LE: loop exit
PB: predicated region body
PF: predicated region fallthrough
CT: control target
= control target key end

     0   :  { %7 = vsyncpa [#allocation3], 0  ;;  %s828_s0 = inlined_call_operand.vmem [shape: s32[16,1], index: 0, kind: input, shape index: {}]   ;;  %s829_s1 = inlined_call_operand.hbm [shape: f32[512,128], index: 1, kind: input, shape index: {}]   ;;  %s830_s2 = inlined_call_operand.hbm [shape: f32[16,128], index: 2, kind: output, shape index: {}]  }
   0x1   :  { %8 = vsyncpa [#allocation4], 0 }
   0x2   :  { %10 = vsyncpa [#allocation4 + $0x1], 0  ;;  %s723_s9 = smov 0   ;;  %s725_s10 = smov 0  }
   0x3   :  { %s727_s11 = smov 0   ;;  %s729_s12 = smov 0  }
   0x4 LB: > { %s744_s13 = sadd.s32 4294967295, %s700_s12   ;;  %s465_s14 = sadd.s32 4294967294, %s700_s12   ;;  %s700_s12 = sphi %s729_s12, %s838_s12   ;;  %s696_s11 = sphi %s727_s11, %s837_s11   ;;  %s692_s10 = sphi %s725_s10, %s836_s10   ;;  %s688_s9 = sphi %s723_s9, %s835_s9  }
   0x5   : > { %s748_s15 = sadd.s32 1, %s700_s12   ;;  %s70_s16 = sadd.s32 1, %s696_s11 }
   0x6   : > { %s67_s17 = ssub.s32 %s700_s12, %s748_s15  ;;  %p80_p0 = scmp.ne.s32.totalorder %s696_s11, %s692_s10 }
   0x7   : > { %p68_p1 = scmp.eq.s32.totalorder %s67_s17, 0  ;;  %p81_p2 = scmp.eq.s32.totalorder %s744_s13, 1 }
   0x8   : > { %p86_p3 = scmp.ne.s32.totalorder %s692_s10, %s688_s9  ;;  %p87_p4 = scmp.eq.s32.totalorder %s465_s14, 1 }
   0x9   : > { %s759_s18 = scalar_select %p68_p1, %s696_s11, %s70_s16  }
   0xa   : > { %p761_p5 = por %p81_p2, %p80_p0  ;;  %p765_p6 = por %p87_p4, %p86_p3 }
   0xb   : > { %p466_p7 = scmp.ge.s32.totalorder %s700_s12, 1  ;;  %p94_p8 = scmp.lt.s32.totalorder %s700_s12, 3 }
   0xc   : > { %s832_s20 = scalar_select %p765_p6, 1, 0 }
   0xd   : > { %p569_p9 = scmp.eq.s32.totalorder %s744_s13, 0  ;;  %p772_p10 = pnand %p466_p7, %p94_p8 }
   0xe   : > { %s702_s22 = smov [#allocation2]  }
   0xf   : > { %s106_s23 = sshll.u32 %s702_s22, 4  ;;  %p561_p11 = pneg %p772_p10  ;;  %s107_s23 = int_to_ptr.vmem [resolvable:$true] %s106_s23 }
  0x10   : > { %s621_s24 = scalar_lea.vmem %s107_s23, 8192  ;;  %p629_p3 = scmp.lt.s32.totalorder %s107_s23, %s107_s23 }
  0x11   : > { %p562_p12 = pnand %p569_p9, %p561_p11  ;;  %p622_p0 = scmp.ne.s32.totalorder %s107_s23, %s621_s24 }
  0x12   : > { %p630_p4 = scmp.lt.s32.totalorder %s621_s24, %s621_s24 }
  0x13   : > { %p612_p13 = pneg %p562_p12 }
  0x14   : > { %p631_p6 = por %p630_p4, %p629_p3 }
  0x15   : > { %p624_p1 = pnand %p622_p0, %p612_p13 }
  0x17   : > { %p625_p2 = pneg %p624_p1 }
  0x19   : > { %p632_p7 = pnand %p631_p6, %p625_p2 }
  0x1b   : > { %635 = shalt.err (!%p632_p7)
}
  0x1c   : > { %s703_s25 = smov 128   ;;  %s704_s26 = smov 8  }
  0x1d   : > { %564 = dma.hbm_to_vmem [thread:$0]  (!%p562_p12), %s829_s1, 8192, %s107_s23, [#allocation3], %s703_s25, %s703_s25, %s704_s26  }
  0x1e   : > { %129 = sbr.rel (%p772_p10) target bundleno = 381 (0x17d), region = 28 }
  0x23   : > { %679 = dma.done.wait (%p569_p9), [#allocation3], 8192  }
  0x24   : > { %681 = vsyncadd (%p569_p9), [#allocation3], 4294959104  ;;  %p150_p8 = scmp.lt.s32.totalorder %s744_s13, 1  ;;  %v705_v0 = vmov 0   ;;  %v206_v2 = vld [vmem:[#allocation2 + $0xf8] sm:$0xff]  ;;  %v205_v6 = vld [vmem:[#allocation2 + $0xf0] sm:$0xff] }
  0x25   : > { %609 = vset.pattern.permute.xlu0 %v705_v0  ;;  %v238_v3 = vld [vmem:[#allocation2 + $0x1f8] sm:$0xff]  ;;  %485 = vmatprep.subr.mxu0 %v206_v2  ;;  %v237_v7 = vld [vmem:[#allocation2 + $0x1f0] sm:$0xff]  ;;  %v204_v10 = vld [vmem:[#allocation2 + $0xe8] sm:$0xff]  ;;  %v155_v2 = vlaneseq  ;;  %s147_s6 = sand.u32 1, %s692_s10   ;;  %s482_s8 = sshll.u32 %s744_s13, 7 }
  0x26   : > { %s151_s29 = scalar_select %p150_p8, %s744_s13, 1  ;;  %v190_v4 = vld [vmem:[#allocation2 + $0x78] sm:$0xff]  ;;  %520 = vmatprep.subr.mxu1 %v238_v3  ;;  %v189_v8 = vld [vmem:[#allocation2 + $0x70] sm:$0xff]  ;;  %v236_v11 = vld [vmem:[#allocation2 + $0x1e8] sm:$0xff] }
  0x27   : > { %v222_v5 = vld [vmem:[#allocation2 + $0x178] sm:$0xff]  ;;  %486 = vmatpush3.msra.mxu0 %v190_v4  ;;  %v221_v9 = vld [vmem:[#allocation2 + $0x170] sm:$0xff]  ;;  %v188_v12 = vld [vmem:[#allocation2 + $0x68] sm:$0xff]  ;;  %v156_v3 = vand.u32 127, %v155_v2  ;;  %s471_s7 = sshll.u32 %s147_s6, 3  ;;  %s392_s22 = scalar_lea.hbm %s830_s2, %s482_s8 }
  0x28   : > { %s472_s30 = sshll.u32 %s151_s29, 3  ;;  %521 = vmatpush3.msra.mxu1 %v222_v5  ;;  %487 = vmatprep.subr.mxu0 %v205_v6  ;;  %v220_v13 = vld [vmem:[#allocation2 + $0x168] sm:$0xff]  ;;  %v203_v14 = vld [vmem:[#allocation2 + $0xe0] sm:$0xff]  ;;  %v202_v18 = vld [vmem:[#allocation2 + $0xd8] sm:$0xff]  ;;  %s149_s14 = scalar_lea.vmem [#allocation5], %s471_s7 }
  0x29   : > { %s153_s5 = scalar_lea.vmem %s828_s0, %s472_s30  ;;  %522 = vmatprep.subr.mxu1 %v237_v7  ;;  %488 = vmatpush3.msra.mxu0 %v189_v8  ;;  %v235_v15 = vld [vmem:[#allocation2 + $0x1e0] sm:$0xff]  ;;  %v234_v19 = vld [vmem:[#allocation2 + $0x1d8] sm:$0xff]  ;;  %v201_v22 = vld [vmem:[#allocation2 + $0xd0] sm:$0xff]  ;;  %v157_v4 = vadd.s32 128, %v156_v3  ;;  %v159_v5 = vadd.s32 384, %v156_v3  ;;  %v158_v6 = vadd.s32 256, %v156_v3 }
  0x2a   : > { %v154_v1 = vld [vmem:[%s153_s5] sm:$0xff]  ;;  %523 = vmatpush3.msra.mxu1 %v221_v9  ;;  %489 = vmatprep.subr.mxu0 %v204_v10  ;;  %v186_v20 = vld [vmem:[#allocation2 + $0x58] sm:$0xff]  ;;  %v233_v23 = vld [vmem:[#allocation2 + $0x1d0] sm:$0xff]  ;;  %v706_v8 = vmov 1.0   ;;  %s394_s16 = sshll.u32 %s149_s14, 4  ;;  %s381_s23 = scalar_lea.sflag [#allocation4], %s147_s6  ;;  %s395_s16 = int_to_ptr.vmem [resolvable:$true] %s394_s16 }
  0x2b   : > { %161 = vperm.xlu0 %609, %v154_v1   ;;  %v187_v16 = vld [vmem:[#allocation2 + $0x60] sm:$0xff]  ;;  %524 = vmatprep.subr.mxu1 %v236_v11  ;;  %v218_v21 = vld [vmem:[#allocation2 + $0x158] sm:$0xff]  ;;  %v185_v24 = vld [vmem:[#allocation2 + $0x50] sm:$0xff]  ;;  %s636_s24 = scalar_lea.vmem %s395_s16, 128  ;;  %s707_s25 = smov [#allocation5]  }
  0x2c   : > { %490 = vmatpush3.msra.mxu0 %v188_v12  ;;  %v219_v17 = vld [vmem:[#allocation2 + $0x160] sm:$0xff]  ;;  %525 = vmatpush3.msra.mxu1 %v220_v13  ;;  %v217_v25 = vld [vmem:[#allocation2 + $0x150] sm:$0xff]  ;;  %v200_v26 = vld [vmem:[#allocation2 + $0xc8] sm:$0xff]  ;;  %p637_p6 = scmp.ne.s32.totalorder %s395_s16, %s636_s24  ;;  %s640_s26 = sshll.u32 %s707_s25, 4  ;;  %s641_s26 = int_to_ptr.vmem [resolvable:$false] %s640_s26 }
  0x2d   : > { %491 = vmatprep.subr.mxu0 %v203_v14  ;;  %526 = vmatprep.subr.mxu1 %v235_v15  ;;  %v232_v27 = vld [vmem:[#allocation2 + $0x1c8] sm:$0xff]  ;;  %v199_v30 = vld [vmem:[#allocation2 + $0xc0] sm:$0xff]  ;;  %v198_v34 = vld [vmem:[#allocation2 + $0xb8] sm:$0xff]  ;;  %s642_s13 = scalar_lea.vmem %s641_s26, 256  ;;  %p643_p11 = scmp.lt.s32.totalorder %s395_s16, %s641_s26 }
  0x2e   : > { %492 = vmatpush3.msra.mxu0 %v187_v16  ;;  %527 = vmatpush3.msra.mxu1 %v219_v17  ;;  %v184_v28 = vld [vmem:[#allocation2 + $0x48] sm:$0xff]  ;;  %v231_v31 = vld [vmem:[#allocation2 + $0x1c0] sm:$0xff]  ;;  %v230_v35 = vld [vmem:[#allocation2 + $0x1b8] sm:$0xff]  ;;  %p638_p9 = pnand %p637_p6, %p761_p5  ;;  %p644_p12 = scmp.lt.s32.totalorder %s642_s13, %s636_s24 }
  0x2f   : > { %493 = vmatprep.subr.mxu0 %v202_v18  ;;  %528 = vmatprep.subr.mxu1 %v234_v19  ;;  %v216_v29 = vld [vmem:[#allocation2 + $0x148] sm:$0xff]  ;;  %v183_v32 = vld [vmem:[#allocation2 + $0x40] sm:$0xff]  ;;  %v182_v36 = vld [vmem:[#allocation2 + $0x38] sm:$0xff] }
  0x30   : > { %494 = vmatpush3.msra.mxu0 %v186_v20  ;;  %529 = vmatpush3.msra.mxu1 %v218_v21  ;;  %v215_v33 = vld [vmem:[#allocation2 + $0x140] sm:$0xff]  ;;  %v214_v37 = vld [vmem:[#allocation2 + $0x138] sm:$0xff]  ;;  %v197_v38 = vld [vmem:[#allocation2 + $0xb0] sm:$0xff]  ;;  %p639_p10 = pneg %p638_p9  ;;  %p645_p13 = por %p644_p12, %p643_p11 }
  0x31   : > { %495 = vmatprep.subr.mxu0 %v201_v22  ;;  %530 = vmatprep.subr.mxu1 %v233_v23  ;;  %v229_v39 = vld [vmem:[#allocation2 + $0x1b0] sm:$0xff]  ;;  %v196_v42 = vld [vmem:[#allocation2 + $0xa8] sm:$0xff]  ;;  %v195_v46 = vld [vmem:[#allocation2 + $0xa0] sm:$0xff] }
  0x32   : > { %496 = vmatpush3.msra.mxu0 %v185_v24  ;;  %531 = vmatpush3.msra.mxu1 %v217_v25  ;;  %v181_v40 = vld [vmem:[#allocation2 + $0x30] sm:$0xff]  ;;  %v228_v43 = vld [vmem:[#allocation2 + $0x1a8] sm:$0xff]  ;;  %v227_v47 = vld [vmem:[#allocation2 + $0x1a0] sm:$0xff]  ;;  %p646_p0 = pnand %p645_p13, %p639_p10 }
  0x33   : > { %497 = vmatprep.subr.mxu0 %v200_v26  ;;  %532 = vmatprep.subr.mxu1 %v232_v27  ;;  %v213_v41 = vld [vmem:[#allocation2 + $0x130] sm:$0xff]  ;;  %v180_v44 = vld [vmem:[#allocation2 + $0x28] sm:$0xff]  ;;  %v179_v48 = vld [vmem:[#allocation2 + $0x20] sm:$0xff] }
  0x34   : > { %498 = vmatpush3.msra.mxu0 %v184_v28  ;;  %533 = vmatpush3.msra.mxu1 %v216_v29  ;;  %v212_v45 = vld [vmem:[#allocation2 + $0x128] sm:$0xff]  ;;  %v211_v49 = vld [vmem:[#allocation2 + $0x120] sm:$0xff]  ;;  %v194_v50 = vld [vmem:[#allocation2 + $0x98] sm:$0xff] }
  0x35   : > { %499 = vmatprep.subr.mxu0 %v199_v30  ;;  %534 = vmatprep.subr.mxu1 %v231_v31  ;;  %v226_v51 = vld [vmem:[#allocation2 + $0x198] sm:$0xff]  ;;  %v193_v54 = vld [vmem:[#allocation2 + $0x90] sm:$0xff]  ;;  %v192_v58 = vld [vmem:[#allocation2 + $0x88] sm:$0xff] }
  0x36   : > { %500 = vmatpush3.msra.mxu0 %v183_v32  ;;  %535 = vmatpush3.msra.mxu1 %v215_v33  ;;  %v178_v52 = vld [vmem:[#allocation2 + $0x18] sm:$0xff]  ;;  %v225_v55 = vld [vmem:[#allocation2 + $0x190] sm:$0xff]  ;;  %v224_v59 = vld [vmem:[#allocation2 + $0x188] sm:$0xff] }
  0x37   : > { %501 = vmatprep.subr.mxu0 %v198_v34  ;;  %536 = vmatprep.subr.mxu1 %v230_v35  ;;  %v210_v53 = vld [vmem:[#allocation2 + $0x118] sm:$0xff]  ;;  %v177_v56 = vld [vmem:[#allocation2 + $0x10] sm:$0xff]  ;;  %v176_v60 = vld [vmem:[#allocation2 + $0x8] sm:$0xff] }
  0x38   : > { %502 = vmatpush3.msra.mxu0 %v182_v36  ;;  %537 = vmatpush3.msra.mxu1 %v214_v37  ;;  %v209_v57 = vld [vmem:[#allocation2 + $0x110] sm:$0xff]  ;;  %v208_v61 = vld [vmem:[#allocation2 + $0x108] sm:$0xff]  ;;  %v191_v62 = vld [vmem:[#allocation2 + $0x80] sm:$0xff] }
  0x39   : > { %503 = vmatprep.subr.mxu0 %v197_v38  ;;  %538 = vmatprep.subr.mxu1 %v229_v39  ;;  %v223_v63 = vld [vmem:[#allocation2 + $0x180] sm:$0xff] }
  0x3a   : > { %504 = vmatpush3.msra.mxu0 %v181_v40  ;;  %539 = vmatpush3.msra.mxu1 %v213_v41  ;;  %v175_v0 = vld [vmem:[#allocation2] sm:$0xff] }
  0x3b   : > { %505 = vmatprep.subr.mxu0 %v196_v42  ;;  %540 = vmatprep.subr.mxu1 %v228_v43  ;;  %v207_v1 = vld [vmem:[#allocation2 + $0x100] sm:$0xff] }
  0x3c   : > { %506 = vmatpush3.msra.mxu0 %v180_v44  ;;  %541 = vmatpush3.msra.mxu1 %v212_v45 }
  0x3d   : > { %507 = vmatprep.subr.mxu0 %v195_v46  ;;  %542 = vmatprep.subr.mxu1 %v227_v47 }
  0x3e   : > { %508 = vmatpush3.msra.mxu0 %v179_v48  ;;  %543 = vmatpush3.msra.mxu1 %v211_v49 }
  0x3f   : > { %509 = vmatprep.subr.mxu0 %v194_v50  ;;  %544 = vmatprep.subr.mxu1 %v226_v51 }
  0x40   : > { %510 = vmatpush3.msra.mxu0 %v178_v52  ;;  %545 = vmatpush3.msra.mxu1 %v210_v53 }
  0x41   : > { %511 = vmatprep.subr.mxu0 %v193_v54  ;;  %546 = vmatprep.subr.mxu1 %v225_v55 }
  0x42   : > { %512 = vmatpush3.msra.mxu0 %v177_v56  ;;  %547 = vmatpush3.msra.mxu1 %v209_v57 }
  0x43   : > { %513 = vmatprep.subr.mxu0 %v192_v58  ;;  %548 = vmatprep.subr.mxu1 %v224_v59 }
  0x44   : > { %514 = vmatpush3.msra.mxu0 %v176_v60  ;;  %549 = vmatpush3.msra.mxu1 %v208_v61 }
  0x45   : > { %515 = vmatprep.subr.mxu0 %v191_v62  ;;  %550 = vmatprep.subr.mxu1 %v223_v63 }
  0x46   : > { %516 = vmatpush3.msra.mxu0 %v175_v0  ;;  %551 = vmatpush3.msra.mxu1 %v207_v1 }
  0xa6   : > { %v162_v7 = vpop.permute.xlu0 %161 }
  0xa7   : > { %vm164_vm0 = vcmp.eq.s32.totalorder %v162_v7, %v157_v4  ;;  %vm166_vm1 = vcmp.eq.s32.totalorder %v162_v7, %v159_v5  ;;  %vm163_vm2 = vcmp.eq.s32.totalorder %v162_v7, %v156_v3  ;;  %vm165_vm3 = vcmp.eq.s32.totalorder %v162_v7, %v158_v6 }
  0xa8   : > { %477 = vmatprep.mubr.msk.f32.mxu0 %vm164_vm0, %v706_v8  ;;  %479 = vmatprep.mubr.msk.f32.mxu1 %vm166_vm1, %v706_v8 }
  0xa9   : > { %478 = vmatmul.mubr.msk.f32.vlgmr.msra.gmra.mxu0 %vm163_vm2, %v706_v8  ;;  %480 = vmatmul.mubr.msk.f32.vlgmr.msra.gmra.mxu1 %vm165_vm3, %v706_v8 }
 0x169   : > { %v517_v9 = vpop.f32.mrf.mxu0  ;;  %v552_v10 = vpop.f32.mrf.mxu1 }
 0x16b   : > { %v518_v11 = vpop.f32.mrf.mxu0  ;;  %v553_v12 = vpop.f32.mrf.mxu1 }
 0x16c   : > { %v519_v13 = vadd.f32 %v518_v11, %v517_v9  ;;  %v554_v14 = vadd.f32 %v553_v12, %v552_v10 }
 0x16e   : > { %v376_v15 = vadd.f32 %v554_v14, %v519_v13 }
 0x170   : > { %379 = vst [vmem:[%s149_s14] sm:$0xff] %v376_v15 }
 0x171   : > { %649 = shalt.err (!%p646_p0)
}
 0x172   : > { %s650_s27 = scalar_lea.hbm %s392_s22, 128  ;;  %s654_s30 = scalar_lea.hbm %s830_s2, 256 }
 0x173   : > { %p651_p1 = scmp.ne.s32.totalorder %s392_s22, %s650_s27  ;;  %p655_p4 = scmp.lt.s32.totalorder %s392_s22, %s830_s2 }
 0x174   : > { %p656_p7 = scmp.lt.s32.totalorder %s654_s30, %s650_s27 }
 0x175   : > { %p652_p2 = pnand %p651_p1, %p761_p5 }
 0x176   : > { %p657_p8 = por %p656_p7, %p655_p4 }
 0x177   : > { %p653_p3 = pneg %p652_p2 }
 0x179   : > { %p658_p6 = pnand %p657_p8, %p653_p3 }
 0x17b   : > { %661 = shalt.err (!%p658_p6)
}
 0x17c   : > { %559 = dma.vmem_to_hbm [thread:$0]  (%p761_p5), %s395_s16, 128, %s392_s22, %s381_s23  }
 0x17d PF: > { %p571_p9 = scmp.ge.s32.totalorder %s700_s12, 2  ;;  %s406_s5 = sand.u32 1, %s688_s9  }
 0x17e   : > { %p834_p10 = scmp.ne.s32.totalorder %s832_s20, 0  ;;  %s407_s6 = scalar_lea.sflag [#allocation4], %s406_s5 }
 0x180   : > { %p566_p11 = pnand %p571_p9, %p834_p10 }
 0x182   : > { %p567_p12 = pneg %p566_p11 }
 0x184   : > { %683 = dma.done.wait (%p567_p12), %s407_s6, 128  }
 0x185   : > { %685 = vsyncadd (%p567_p12), %s407_s6, 4294967168  ;;  %p13_p13 = scmp.ge.s32.totalorder %s748_s15, 4   ;;  %s835_s9 = smov %s692_s10 }
 0x186   : > { %s836_s10 = smov %s696_s11  ;;  %s837_s11 = smov %s759_s18 }
 0x187   : > { %s838_s12 = smov %s748_s15  ;;  %15 = sbr.rel (!%p13_p13) target bundleno = 4 (0x4), region = 68 }
 0x18c   :  { %412 = vsyncpa [#allocation3], 1 }
 0x18d   :  { %414 = vsyncpa [#allocation3 + $0x1], 1 }
 0x18e   :  { %415 = vsyncpa [#allocation4], 1 }
 0x18f   :  { %417 = vsyncpa [#allocation4 + $0x1], 1 }

// kernel: tpu_custom_call.1
= control target key start
LH: loop header
LB: loop body
LE: loop exit
PB: predicated region body
PF: predicated region fallthrough
CT: control target
= control target key end

     0   :  { %7 = vsyncpa [#allocation3], 0  ;;  %s828_s0 = inlined_call_operand.vmem [shape: s32[16,1], index: 0, kind: input, shape index: {}]   ;;  %s829_s1 = inlined_call_operand.hbm [shape: f32[512,128], index: 1, kind: input, shape index: {}]   ;;  %s830_s2 = inlined_call_operand.hbm [shape: f32[16,128], index: 2, kind: output, shape index: {}]  }
   0x1   :  { %8 = vsyncpa [#allocation4], 0 }
   0x2   :  { %10 = vsyncpa [#allocation4 + $0x1], 0  ;;  %s723_s9 = smov 0   ;;  %s725_s10 = smov 0  }
   0x3   :  { %s727_s11 = smov 0   ;;  %s729_s12 = smov 0  }
   0x4 LB: > { %s744_s13 = sadd.s32 4294967295, %s700_s12   ;;  %s465_s14 = sadd.s32 4294967294, %s700_s12   ;;  %s700_s12 = sphi %s729_s12, %s838_s12   ;;  %s696_s11 = sphi %s727_s11, %s837_s11   ;;  %s692_s10 = sphi %s725_s10, %s836_s10   ;;  %s688_s9 = sphi %s723_s9, %s835_s9  }
   0x5   : > { %s748_s15 = sadd.s32 1, %s700_s12   ;;  %s70_s16 = sadd.s32 1, %s696_s11 }
   0x6   : > { %s67_s17 = ssub.s32 %s700_s12, %s748_s15  ;;  %p80_p0 = scmp.ne.s32.totalorder %s696_s11, %s692_s10 }
   0x7   : > { %p68_p1 = scmp.eq.s32.totalorder %s67_s17, 0  ;;  %p81_p2 = scmp.eq.s32.totalorder %s744_s13, 1 }
   0x8   : > { %p86_p3 = scmp.ne.s32.totalorder %s692_s10, %s688_s9  ;;  %p87_p4 = scmp.eq.s32.totalorder %s465_s14, 1 }
   0x9   : > { %s759_s18 = scalar_select %p68_p1, %s696_s11, %s70_s16  }
   0xa   : > { %p761_p5 = por %p81_p2, %p80_p0  ;;  %p765_p6 = por %p87_p4, %p86_p3 }
   0xb   : > { %p466_p7 = scmp.ge.s32.totalorder %s700_s12, 1  ;;  %p94_p8 = scmp.lt.s32.totalorder %s700_s12, 3 }
   0xc   : > { %s832_s20 = scalar_select %p765_p6, 1, 0 }
   0xd   : > { %p569_p9 = scmp.eq.s32.totalorder %s744_s13, 0  ;;  %p772_p10 = pnand %p466_p7, %p94_p8 }
   0xe   : > { %s702_s22 = smov [#allocation2]  }
   0xf   : > { %s106_s23 = sshll.u32 %s702_s22, 4  ;;  %p561_p11 = pneg %p772_p10  ;;  %s107_s23 = int_to_ptr.vmem [resolvable:$true] %s106_s23 }
  0x10   : > { %s621_s24 = scalar_lea.vmem %s107_s23, 8192  ;;  %p629_p3 = scmp.lt.s32.totalorder %s107_s23, %s107_s23 }
  0x11   : > { %p562_p12 = pnand %p569_p9, %p561_p11  ;;  %p622_p0 = scmp.ne.s32.totalorder %s107_s23, %s621_s24 }
  0x12   : > { %p630_p4 = scmp.lt.s32.totalorder %s621_s24, %s621_s24 }
  0x13   : > { %p612_p13 = pneg %p562_p12 }
  0x14   : > { %p631_p6 = por %p630_p4, %p629_p3 }
  0x15   : > { %p624_p1 = pnand %p622_p0, %p612_p13 }
  0x17   : > { %p625_p2 = pneg %p624_p1 }
  0x19   : > { %p632_p7 = pnand %p631_p6, %p625_p2 }
  0x1b   : > { %635 = shalt.err (!%p632_p7)
}
  0x1c   : > { %s703_s25 = smov 128   ;;  %s704_s26 = smov 8  }
  0x1d   : > { %564 = dma.hbm_to_vmem [thread:$0]  (!%p562_p12), %s829_s1, 8192, %s107_s23, [#allocation3], %s703_s25, %s703_s25, %s704_s26  }
  0x1e   : > { %129 = sbr.rel (%p772_p10) target bundleno = 381 (0x17d), region = 28 }
  0x23   : > { %679 = dma.done.wait (%p569_p9), [#allocation3], 8192  }
  0x24   : > { %681 = vsyncadd (%p569_p9), [#allocation3], 4294959104  ;;  %p150_p8 = scmp.lt.s32.totalorder %s744_s13, 1  ;;  %v705_v0 = vmov 0   ;;  %v206_v2 = vld [vmem:[#allocation2 + $0xf8] sm:$0xff]  ;;  %v205_v6 = vld [vmem:[#allocation2 + $0xf0] sm:$0xff] }
  0x25   : > { %609 = vset.pattern.permute.xlu0 %v705_v0  ;;  %v238_v3 = vld [vmem:[#allocation2 + $0x1f8] sm:$0xff]  ;;  %485 = vmatprep.subr.mxu0 %v206_v2  ;;  %v237_v7 = vld [vmem:[#allocation2 + $0x1f0] sm:$0xff]  ;;  %v204_v10 = vld [vmem:[#allocation2 + $0xe8] sm:$0xff]  ;;  %v155_v2 = vlaneseq  ;;  %s147_s6 = sand.u32 1, %s692_s10   ;;  %s482_s8 = sshll.u32 %s744_s13, 7 }
  0x26   : > { %s151_s29 = scalar_select %p150_p8, %s744_s13, 1  ;;  %v190_v4 = vld [vmem:[#allocation2 + $0x78] sm:$0xff]  ;;  %520 = vmatprep.subr.mxu1 %v238_v3  ;;  %v189_v8 = vld [vmem:[#allocation2 + $0x70] sm:$0xff]  ;;  %v236_v11 = vld [vmem:[#allocation2 + $0x1e8] sm:$0xff] }
  0x27   : > { %v222_v5 = vld [vmem:[#allocation2 + $0x178] sm:$0xff]  ;;  %486 = vmatpush3.msra.mxu0 %v190_v4  ;;  %v221_v9 = vld [vmem:[#allocation2 + $0x170] sm:$0xff]  ;;  %v188_v12 = vld [vmem:[#allocation2 + $0x68] sm:$0xff]  ;;  %v156_v3 = vand.u32 127, %v155_v2  ;;  %s471_s7 = sshll.u32 %s147_s6, 3  ;;  %s392_s22 = scalar_lea.hbm %s830_s2, %s482_s8 }
  0x28   : > { %s472_s30 = sshll.u32 %s151_s29, 3  ;;  %521 = vmatpush3.msra.mxu1 %v222_v5  ;;  %487 = vmatprep.subr.mxu0 %v205_v6  ;;  %v220_v13 = vld [vmem:[#allocation2 + $0x168] sm:$0xff]  ;;  %v203_v14 = vld [vmem:[#allocation2 + $0xe0] sm:$0xff]  ;;  %v202_v18 = vld [vmem:[#allocation2 + $0xd8] sm:$0xff]  ;;  %s149_s14 = scalar_lea.vmem [#allocation5], %s471_s7 }
  0x29   : > { %s153_s5 = scalar_lea.vmem %s828_s0, %s472_s30  ;;  %522 = vmatprep.subr.mxu1 %v237_v7  ;;  %488 = vmatpush3.msra.mxu0 %v189_v8  ;;  %v235_v15 = vld [vmem:[#allocation2 + $0x1e0] sm:$0xff]  ;;  %v234_v19 = vld [vmem:[#allocation2 + $0x1d8] sm:$0xff]  ;;  %v201_v22 = vld [vmem:[#allocation2 + $0xd0] sm:$0xff]  ;;  %v157_v4 = vadd.s32 128, %v156_v3  ;;  %v159_v5 = vadd.s32 384, %v156_v3  ;;  %v158_v6 = vadd.s32 256, %v156_v3 }
  0x2a   : > { %v154_v1 = vld [vmem:[%s153_s5] sm:$0xff]  ;;  %523 = vmatpush3.msra.mxu1 %v221_v9  ;;  %489 = vmatprep.subr.mxu0 %v204_v10  ;;  %v186_v20 = vld [vmem:[#allocation2 + $0x58] sm:$0xff]  ;;  %v233_v23 = vld [vmem:[#allocation2 + $0x1d0] sm:$0xff]  ;;  %v706_v8 = vmov 1.0   ;;  %s394_s16 = sshll.u32 %s149_s14, 4  ;;  %s381_s23 = scalar_lea.sflag [#allocation4], %s147_s6  ;;  %s395_s16 = int_to_ptr.vmem [resolvable:$true] %s394_s16 }
  0x2b   : > { %161 = vperm.xlu0 %609, %v154_v1   ;;  %v187_v16 = vld [vmem:[#allocation2 + $0x60] sm:$0xff]  ;;  %524 = vmatprep.subr.mxu1 %v236_v11  ;;  %v218_v21 = vld [vmem:[#allocation2 + $0x158] sm:$0xff]  ;;  %v185_v24 = vld [vmem:[#allocation2 + $0x50] sm:$0xff]  ;;  %s636_s24 = scalar_lea.vmem %s395_s16, 128  ;;  %s707_s25 = smov [#allocation5]  }
  0x2c   : > { %490 = vmatpush3.msra.mxu0 %v188_v12  ;;  %v219_v17 = vld [vmem:[#allocation2 + $0x160] sm:$0xff]  ;;  %525 = vmatpush3.msra.mxu1 %v220_v13  ;;  %v217_v25 = vld [vmem:[#allocation2 + $0x150] sm:$0xff]  ;;  %v200_v26 = vld [vmem:[#allocation2 + $0xc8] sm:$0xff]  ;;  %p637_p6 = scmp.ne.s32.totalorder %s395_s16, %s636_s24  ;;  %s640_s26 = sshll.u32 %s707_s25, 4  ;;  %s641_s26 = int_to_ptr.vmem [resolvable:$false] %s640_s26 }
  0x2d   : > { %491 = vmatprep.subr.mxu0 %v203_v14  ;;  %526 = vmatprep.subr.mxu1 %v235_v15  ;;  %v232_v27 = vld [vmem:[#allocation2 + $0x1c8] sm:$0xff]  ;;  %v199_v30 = vld [vmem:[#allocation2 + $0xc0] sm:$0xff]  ;;  %v198_v34 = vld [vmem:[#allocation2 + $0xb8] sm:$0xff]  ;;  %s642_s13 = scalar_lea.vmem %s641_s26, 256  ;;  %p643_p11 = scmp.lt.s32.totalorder %s395_s16, %s641_s26 }
  0x2e   : > { %492 = vmatpush3.msra.mxu0 %v187_v16  ;;  %527 = vmatpush3.msra.mxu1 %v219_v17  ;;  %v184_v28 = vld [vmem:[#allocation2 + $0x48] sm:$0xff]  ;;  %v231_v31 = vld [vmem:[#allocation2 + $0x1c0] sm:$0xff]  ;;  %v230_v35 = vld [vmem:[#allocation2 + $0x1b8] sm:$0xff]  ;;  %p638_p9 = pnand %p637_p6, %p761_p5  ;;  %p644_p12 = scmp.lt.s32.totalorder %s642_s13, %s636_s24 }
  0x2f   : > { %493 = vmatprep.subr.mxu0 %v202_v18  ;;  %528 = vmatprep.subr.mxu1 %v234_v19  ;;  %v216_v29 = vld [vmem:[#allocation2 + $0x148] sm:$0xff]  ;;  %v183_v32 = vld [vmem:[#allocation2 + $0x40] sm:$0xff]  ;;  %v182_v36 = vld [vmem:[#allocation2 + $0x38] sm:$0xff] }
  0x30   : > { %494 = vmatpush3.msra.mxu0 %v186_v20  ;;  %529 = vmatpush3.msra.mxu1 %v218_v21  ;;  %v215_v33 = vld [vmem:[#allocation2 + $0x140] sm:$0xff]  ;;  %v214_v37 = vld [vmem:[#allocation2 + $0x138] sm:$0xff]  ;;  %v197_v38 = vld [vmem:[#allocation2 + $0xb0] sm:$0xff]  ;;  %p639_p10 = pneg %p638_p9  ;;  %p645_p13 = por %p644_p12, %p643_p11 }
  0x31   : > { %495 = vmatprep.subr.mxu0 %v201_v22  ;;  %530 = vmatprep.subr.mxu1 %v233_v23  ;;  %v229_v39 = vld [vmem:[#allocation2 + $0x1b0] sm:$0xff]  ;;  %v196_v42 = vld [vmem:[#allocation2 + $0xa8] sm:$0xff]  ;;  %v195_v46 = vld [vmem:[#allocation2 + $0xa0] sm:$0xff] }
  0x32   : > { %496 = vmatpush3.msra.mxu0 %v185_v24  ;;  %531 = vmatpush3.msra.mxu1 %v217_v25  ;;  %v181_v40 = vld [vmem:[#allocation2 + $0x30] sm:$0xff]  ;;  %v228_v43 = vld [vmem:[#allocation2 + $0x1a8] sm:$0xff]  ;;  %v227_v47 = vld [vmem:[#allocation2 + $0x1a0] sm:$0xff]  ;;  %p646_p0 = pnand %p645_p13, %p639_p10 }
  0x33   : > { %497 = vmatprep.subr.mxu0 %v200_v26  ;;  %532 = vmatprep.subr.mxu1 %v232_v27  ;;  %v213_v41 = vld [vmem:[#allocation2 + $0x130] sm:$0xff]  ;;  %v180_v44 = vld [vmem:[#allocation2 + $0x28] sm:$0xff]  ;;  %v179_v48 = vld [vmem:[#allocation2 + $0x20] sm:$0xff] }
  0x34   : > { %498 = vmatpush3.msra.mxu0 %v184_v28  ;;  %533 = vmatpush3.msra.mxu1 %v216_v29  ;;  %v212_v45 = vld [vmem:[#allocation2 + $0x128] sm:$0xff]  ;;  %v211_v49 = vld [vmem:[#allocation2 + $0x120] sm:$0xff]  ;;  %v194_v50 = vld [vmem:[#allocation2 + $0x98] sm:$0xff] }
  0x35   : > { %499 = vmatprep.subr.mxu0 %v199_v30  ;;  %534 = vmatprep.subr.mxu1 %v231_v31  ;;  %v226_v51 = vld [vmem:[#allocation2 + $0x198] sm:$0xff]  ;;  %v193_v54 = vld [vmem:[#allocation2 + $0x90] sm:$0xff]  ;;  %v192_v58 = vld [vmem:[#allocation2 + $0x88] sm:$0xff] }
  0x36   : > { %500 = vmatpush3.msra.mxu0 %v183_v32  ;;  %535 = vmatpush3.msra.mxu1 %v215_v33  ;;  %v178_v52 = vld [vmem:[#allocation2 + $0x18] sm:$0xff]  ;;  %v225_v55 = vld [vmem:[#allocation2 + $0x190] sm:$0xff]  ;;  %v224_v59 = vld [vmem:[#allocation2 + $0x188] sm:$0xff] }
  0x37   : > { %501 = vmatprep.subr.mxu0 %v198_v34  ;;  %536 = vmatprep.subr.mxu1 %v230_v35  ;;  %v210_v53 = vld [vmem:[#allocation2 + $0x118] sm:$0xff]  ;;  %v177_v56 = vld [vmem:[#allocation2 + $0x10] sm:$0xff]  ;;  %v176_v60 = vld [vmem:[#allocation2 + $0x8] sm:$0xff] }
  0x38   : > { %502 = vmatpush3.msra.mxu0 %v182_v36  ;;  %537 = vmatpush3.msra.mxu1 %v214_v37  ;;  %v209_v57 = vld [vmem:[#allocation2 + $0x110] sm:$0xff]  ;;  %v208_v61 = vld [vmem:[#allocation2 + $0x108] sm:$0xff]  ;;  %v191_v62 = vld [vmem:[#allocation2 + $0x80] sm:$0xff] }
  0x39   : > { %503 = vmatprep.subr.mxu0 %v197_v38  ;;  %538 = vmatprep.subr.mxu1 %v229_v39  ;;  %v223_v63 = vld [vmem:[#allocation2 + $0x180] sm:$0xff] }
  0x3a   : > { %504 = vmatpush3.msra.mxu0 %v181_v40  ;;  %539 = vmatpush3.msra.mxu1 %v213_v41  ;;  %v175_v0 = vld [vmem:[#allocation2] sm:$0xff] }
  0x3b   : > { %505 = vmatprep.subr.mxu0 %v196_v42  ;;  %540 = vmatprep.subr.mxu1 %v228_v43  ;;  %v207_v1 = vld [vmem:[#allocation2 + $0x100] sm:$0xff] }
  0x3c   : > { %506 = vmatpush3.msra.mxu0 %v180_v44  ;;  %541 = vmatpush3.msra.mxu1 %v212_v45 }
  0x3d   : > { %507 = vmatprep.subr.mxu0 %v195_v46  ;;  %542 = vmatprep.subr.mxu1 %v227_v47 }
  0x3e   : > { %508 = vmatpush3.msra.mxu0 %v179_v48  ;;  %543 = vmatpush3.msra.mxu1 %v211_v49 }
  0x3f   : > { %509 = vmatprep.subr.mxu0 %v194_v50  ;;  %544 = vmatprep.subr.mxu1 %v226_v51 }
  0x40   : > { %510 = vmatpush3.msra.mxu0 %v178_v52  ;;  %545 = vmatpush3.msra.mxu1 %v210_v53 }
  0x41   : > { %511 = vmatprep.subr.mxu0 %v193_v54  ;;  %546 = vmatprep.subr.mxu1 %v225_v55 }
  0x42   : > { %512 = vmatpush3.msra.mxu0 %v177_v56  ;;  %547 = vmatpush3.msra.mxu1 %v209_v57 }
  0x43   : > { %513 = vmatprep.subr.mxu0 %v192_v58  ;;  %548 = vmatprep.subr.mxu1 %v224_v59 }
  0x44   : > { %514 = vmatpush3.msra.mxu0 %v176_v60  ;;  %549 = vmatpush3.msra.mxu1 %v208_v61 }
  0x45   : > { %515 = vmatprep.subr.mxu0 %v191_v62  ;;  %550 = vmatprep.subr.mxu1 %v223_v63 }
  0x46   : > { %516 = vmatpush3.msra.mxu0 %v175_v0  ;;  %551 = vmatpush3.msra.mxu1 %v207_v1 }
  0xa6   : > { %v162_v7 = vpop.permute.xlu0 %161 }
  0xa7   : > { %vm164_vm0 = vcmp.eq.s32.totalorder %v162_v7, %v157_v4  ;;  %vm166_vm1 = vcmp.eq.s32.totalorder %v162_v7, %v159_v5  ;;  %vm163_vm2 = vcmp.eq.s32.totalorder %v162_v7, %v156_v3  ;;  %vm165_vm3 = vcmp.eq.s32.totalorder %v162_v7, %v158_v6 }
  0xa8   : > { %477 = vmatprep.mubr.msk.f32.mxu0 %vm164_vm0, %v706_v8  ;;  %479 = vmatprep.mubr.msk.f32.mxu1 %vm166_vm1, %v706_v8 }
  0xa9   : > { %478 = vmatmul.mubr.msk.f32.vlgmr.msra.gmra.mxu0 %vm163_vm2, %v706_v8  ;;  %480 = vmatmul.mubr.msk.f32.vlgmr.msra.gmra.mxu1 %vm165_vm3, %v706_v8 }
 0x169   : > { %v517_v9 = vpop.f32.mrf.mxu0  ;;  %v552_v10 = vpop.f32.mrf.mxu1 }
 0x16b   : > { %v518_v11 = vpop.f32.mrf.mxu0  ;;  %v553_v12 = vpop.f32.mrf.mxu1 }
 0x16c   : > { %v519_v13 = vadd.f32 %v518_v11, %v517_v9  ;;  %v554_v14 = vadd.f32 %v553_v12, %v552_v10 }
 0x16e   : > { %v376_v15 = vadd.f32 %v554_v14, %v519_v13 }
 0x170   : > { %379 = vst [vmem:[%s149_s14] sm:$0xff] %v376_v15 }
 0x171   : > { %649 = shalt.err (!%p646_p0)
}
 0x172   : > { %s650_s27 = scalar_lea.hbm %s392_s22, 128  ;;  %s654_s30 = scalar_lea.hbm %s830_s2, 256 }
 0x173   : > { %p651_p1 = scmp.ne.s32.totalorder %s392_s22, %s650_s27  ;;  %p655_p4 = scmp.lt.s32.totalorder %s392_s22, %s830_s2 }
 0x174   : > { %p656_p7 = scmp.lt.s32.totalorder %s654_s30, %s650_s27 }
 0x175   : > { %p652_p2 = pnand %p651_p1, %p761_p5 }
 0x176   : > { %p657_p8 = por %p656_p7, %p655_p4 }
 0x177   : > { %p653_p3 = pneg %p652_p2 }
 0x179   : > { %p658_p6 = pnand %p657_p8, %p653_p3 }
 0x17b   : > { %661 = shalt.err (!%p658_p6)
}
 0x17c   : > { %559 = dma.vmem_to_hbm [thread:$0]  (%p761_p5), %s395_s16, 128, %s392_s22, %s381_s23  }
 0x17d PF: > { %p571_p9 = scmp.ge.s32.totalorder %s700_s12, 2  ;;  %s406_s5 = sand.u32 1, %s688_s9  }
 0x17e   : > { %p834_p10 = scmp.ne.s32.totalorder %s832_s20, 0  ;;  %s407_s6 = scalar_lea.sflag [#allocation4], %s406_s5 }
 0x180   : > { %p566_p11 = pnand %p571_p9, %p834_p10 }
 0x182   : > { %p567_p12 = pneg %p566_p11 }
 0x184   : > { %683 = dma.done.wait (%p567_p12), %s407_s6, 128  }
 0x185   : > { %685 = vsyncadd (%p567_p12), %s407_s6, 4294967168  ;;  %p13_p13 = scmp.ge.s32.totalorder %s748_s15, 4   ;;  %s835_s9 = smov %s692_s10 }
 0x186   : > { %s836_s10 = smov %s696_s11  ;;  %s837_s11 = smov %s759_s18 }
 0x187   : > { %s838_s12 = smov %s748_s15  ;;  %15 = sbr.rel (!%p13_p13) target bundleno = 4 (0x4), region = 68 }
 0x18c   :  { %412 = vsyncpa [#allocation3], 1 }
 0x18d   :  { %414 = vsyncpa [#allocation3 + $0x1], 1 }
 0x18e   :  { %415 = vsyncpa [#allocation4], 1 }
 0x18f   :  { %417 = vsyncpa [#allocation4 + $0x1], 1 }

</bundles_post_ra>
